<compile_context>
chip_gen: v7x
topology: tpu7x:2x2x1
jax: 0.10.0
libtpu: 0.0.40
codegen_flags: <defaults>
</compile_context>

<pallas_src>
import jax
import jax.numpy as jnp
from jax.experimental import pallas as pl
from jax.experimental.pallas import tpu as pltpu

K = 11          # kernel_size
PAD = K // 2    # padding=5 -> "same" length output


def pa_kernel(x_ref, w_ref, b_ref, o_ref, xp_ref):
    # x_ref : (1, CT, L)            input block (one batch, one channel tile)
    # w_ref : (K, CT, 1)            depthwise taps, tap-major
    # b_ref : (CT, 1)               per-channel bias
    # o_ref : (1, CT, L)            output block
    # xp_ref: (1, CT, L + 2*PAD)    f32 VMEM scratch (zero-halo padded copy)
    L = x_ref.shape[-1]
    ct = x_ref.shape[1]

    x32 = x_ref[...].astype(jnp.float32)                     # (1, CT, L)

    # Build the zero-padded copy in VMEM.  Halos are rewritten every grid step
    # so the result is correct even when the grid is sharded across cores.
    zhalo = jnp.zeros((1, ct, PAD), jnp.float32)
    xp_ref[:, :, 0:PAD] = zhalo
    xp_ref[:, :, PAD + L:PAD + L + PAD] = zhalo
    xp_ref[:, :, PAD:PAD + L] = x32

    b = b_ref[...].astype(jnp.float32)[None]                 # (1, CT, 1)

    # Unrolled depthwise conv: acc[n,c,l] = b[c] + sum_k xp[n,c,l+k] * w[k,c].
    # Fold bias into the tap-0 product (no zeros materialization).
    w0 = w_ref[0].astype(jnp.float32)[None]                  # (1, CT, 1)
    acc = xp_ref[:, :, 0:L] * w0 + b
    for k in range(1, K):
        wk = w_ref[k].astype(jnp.float32)[None]              # (1, CT, 1)
        acc = acc + xp_ref[:, :, k:k + L] * wk

    # sigmoid(z) = 0.5 * (tanh(z/2) + 1): transcendental goes to the EUP slot.
    gate = 0.5 * jnp.tanh(0.5 * acc) + 0.5
    o_ref[...] = (x32 * gate).astype(o_ref.dtype)


def _choose_c_tile(C, L):
    """Largest channel tile that (a) keeps BlockSpecs legal (multiple of 8 or
    the full channel dim, and a divisor of C) and (b) keeps each f32 slab
    around <=2 MiB so double-buffered in/out + scratch stay well inside v7x's
    64 MiB VMEM."""
    cands = [ct for ct in range(8, C + 1, 8) if C % ct == 0]
    if C not in cands:
        cands.append(C)
    budget = 2 << 20  # ~2 MiB per (CT, L+2*PAD) f32 slab
    fitting = [ct for ct in cands if ct * (L + 2 * PAD) * 4 <= budget]
    return max(fitting) if fitting else min(cands)


def pa_forward(x, weight, bias, *, c_tile=None):
    """x: (N, C, L); weight: (C, 1, K); bias: (C,) -> (N, C, L) (same dtype as x)."""
    N, C, L = x.shape
    assert weight.shape == (C, 1, K) and bias.shape == (C,)
    if c_tile is None:
        c_tile = _choose_c_tile(C, L)
    assert C % c_tile == 0 and (c_tile % 8 == 0 or c_tile == C)

    # Glue (tiny, done once): weights tap-major (K, C, 1), bias (C, 1).
    w_kc1 = jnp.transpose(weight.reshape(C, K), (1, 0))[:, :, None]
    b_c1 = bias.reshape(C, 1)

    grid = (N, C // c_tile)
    return pl.pallas_call(
        pa_kernel,
        out_shape=jax.ShapeDtypeStruct((N, C, L), x.dtype),
        grid_spec=pltpu.PrefetchScalarGridSpec(
            num_scalar_prefetch=0,
            grid=grid,
            in_specs=[
                pl.BlockSpec((1, c_tile, L), lambda n, c: (n, c, 0)),   # x
                pl.BlockSpec((K, c_tile, 1), lambda n, c: (0, c, 0)),   # taps
                pl.BlockSpec((c_tile, 1), lambda n, c: (c, 0)),         # bias
            ],
            out_specs=pl.BlockSpec((1, c_tile, L), lambda n, c: (n, c, 0)),
            scratch_shapes=[
                pltpu.VMEM((1, c_tile, L + 2 * PAD), jnp.float32),      # padded copy
            ],
        ),
        compiler_params=pltpu.CompilerParams(
            dimension_semantics=("parallel", "parallel"),
            vmem_limit_bytes=32 * 1024 * 1024,
        ),
    )(x, w_kc1, b_c1)


def pa_reference(x, weight, bias):
    """Pure-JAX reference (depthwise conv1d, padding=5, groups=C + sigmoid gate)."""
    N, C, L = x.shape
    x_pad = jnp.pad(x.astype(jnp.float32), ((0, 0), (0, 0), (PAD, PAD)))
    w2d = weight.reshape(C, K).astype(jnp.float32)
    acc = jnp.zeros((N, C, L), jnp.float32)
    for k in range(K):
        acc = acc + x_pad[:, :, k:k + L] * w2d[:, k][None, :, None]
    acc = acc + bias.astype(jnp.float32)[None, :, None]
    return (x.astype(jnp.float32) * jax.nn.sigmoid(acc)).astype(x.dtype)


if __name__ == "__main__":
    # Small shapes consistent with the module: x is (batch, dim, seq_len).
    batch, dim, seq = 2, 8, 64

    key = jax.random.PRNGKey(0)
    kx, kw, kb = jax.random.split(key, 3)

    x = jax.random.normal(kx, (batch, dim, seq), dtype=jnp.float32)
    # Conv1d(dim, dim, 11, groups=dim) parameter shapes: weight (dim,1,K), bias (dim,)
    weight = jax.random.normal(kw, (dim, 1, K), dtype=jnp.float32) * 0.1
    bias = jax.random.normal(kb, (dim,), dtype=jnp.float32) * 0.1

    out = pa_forward(x, weight, bias)
    out = jax.block_until_ready(out)

    ref = pa_reference(x, weight, bias)
    assert out.shape == (batch, dim, seq)
    assert jnp.allclose(out, ref, atol=1e-5, rtol=1e-5), "mismatch vs reference"

    print("KERNEL_OK")
</pallas_src>

<mosaic_0001>
module attributes {stable_mosaic.version = 11 : i64} {
  func.func @pa_kernel(%arg0: i32, %arg1: i32, %arg2: memref<1x8x64xf32, #tpu.memory_space<vmem>>, %arg3: memref<11x8x1xf32, #tpu.memory_space<vmem>>, %arg4: memref<8x1xf32, #tpu.memory_space<vmem>>, %arg5: memref<1x8x64xf32, #tpu.memory_space<vmem>>, %arg6: memref<1x8x74xf32, #tpu.memory_space<vmem>>) attributes {dimension_semantics = [#tpu.dimension_semantics<parallel>, #tpu.dimension_semantics<parallel>], iteration_bounds = array<i64: 2, 1>, scalar_prefetch = 0 : i64, scratch_operands = 1 : i64, tpu.core_type = #tpu.core_type<tc>, window_params = [{transform_indices = @transform_0, window_bounds = array<i64: 1, 8, 64>}, {transform_indices = @transform_1, window_bounds = array<i64: 11, 8, 1>}, {transform_indices = @transform_2, window_bounds = array<i64: 8, 1>}, {transform_indices = @transform_3, window_bounds = array<i64: 1, 8, 64>}]} {
    %c0 = arith.constant 0 : index
    %c0_0 = arith.constant 0 : index
    %c0_1 = arith.constant 0 : index
    %0 = vector.load %arg2[%c0, %c0_0, %c0_1] : memref<1x8x64xf32, #tpu.memory_space<vmem>>, vector<1x8x64xf32>
    %cst = arith.constant 0.000000e+00 : f32
    %1 = vector.broadcast %cst : f32 to vector<1x8x5xf32>
    %c0_2 = arith.constant 0 : index
    %c0_3 = arith.constant 0 : index
    %c0_4 = arith.constant 0 : index
    %2 = vector.load %arg6[%c0_2, %c0_3, %c0_4] : memref<1x8x74xf32, #tpu.memory_space<vmem>>, vector<1x8x5xf32>
    tpu.vector_store %arg6[%c0_2, %c0_3, %c0_4], %1 {strides = array<i32>} : memref<1x8x74xf32, #tpu.memory_space<vmem>>, vector<1x8x5xf32>,
    %c0_5 = arith.constant 0 : index
    %c0_6 = arith.constant 0 : index
    %c69 = arith.constant 69 : index
    %3 = vector.load %arg6[%c0_5, %c0_6, %c69] : memref<1x8x74xf32, #tpu.memory_space<vmem>>, vector<1x8x5xf32>
    tpu.vector_store %arg6[%c0_5, %c0_6, %c69], %1 {strides = array<i32>} : memref<1x8x74xf32, #tpu.memory_space<vmem>>, vector<1x8x5xf32>,
    %c0_7 = arith.constant 0 : index
    %c0_8 = arith.constant 0 : index
    %c5 = arith.constant 5 : index
    %4 = vector.load %arg6[%c0_7, %c0_8, %c5] : memref<1x8x74xf32, #tpu.memory_space<vmem>>, vector<1x8x64xf32>
    tpu.vector_store %arg6[%c0_7, %c0_8, %c5], %0 {strides = array<i32>} : memref<1x8x74xf32, #tpu.memory_space<vmem>>, vector<1x8x64xf32>,
    %c0_9 = arith.constant 0 : index
    %c0_10 = arith.constant 0 : index
    %5 = vector.load %arg4[%c0_9, %c0_10] : memref<8x1xf32, #tpu.memory_space<vmem>>, vector<8x1xf32>
    %6 = vector.shape_cast %5 : vector<8x1xf32> to vector<1x8x1xf32>
    %c0_11 = arith.constant 0 : index
    %c0_12 = arith.constant 0 : index
    %c0_13 = arith.constant 0 : index
    %7 = vector.load %arg3[%c0_11, %c0_12, %c0_13] : memref<11x8x1xf32, #tpu.memory_space<vmem>>, vector<1x8x1xf32>
    %8 = vector.shape_cast %7 : vector<1x8x1xf32> to vector<8x1xf32>
    %9 = vector.shape_cast %8 : vector<8x1xf32> to vector<1x8x1xf32>
    %c0_14 = arith.constant 0 : index
    %c0_15 = arith.constant 0 : index
    %c0_16 = arith.constant 0 : index
    %10 = vector.load %arg6[%c0_14, %c0_15, %c0_16] : memref<1x8x74xf32, #tpu.memory_space<vmem>>, vector<1x8x64xf32>
    %11 = vector.broadcast %9 : vector<1x8x1xf32> to vector<1x8x64xf32>
    %12 = arith.mulf %10, %11 : vector<1x8x64xf32>
    %13 = vector.broadcast %6 : vector<1x8x1xf32> to vector<1x8x64xf32>
    %14 = arith.addf %12, %13 : vector<1x8x64xf32>
    %c1 = arith.constant 1 : index
    %c0_17 = arith.constant 0 : index
    %c0_18 = arith.constant 0 : index
    %15 = vector.load %arg3[%c1, %c0_17, %c0_18] : memref<11x8x1xf32, #tpu.memory_space<vmem>>, vector<1x8x1xf32>
    %16 = vector.shape_cast %15 : vector<1x8x1xf32> to vector<8x1xf32>
    %17 = vector.shape_cast %16 : vector<8x1xf32> to vector<1x8x1xf32>
    %c0_19 = arith.constant 0 : index
    %c0_20 = arith.constant 0 : index
    %c1_21 = arith.constant 1 : index
    %18 = vector.load %arg6[%c0_19, %c0_20, %c1_21] : memref<1x8x74xf32, #tpu.memory_space<vmem>>, vector<1x8x64xf32>
    %19 = vector.broadcast %17 : vector<1x8x1xf32> to vector<1x8x64xf32>
    %20 = arith.mulf %18, %19 : vector<1x8x64xf32>
    %21 = arith.addf %14, %20 : vector<1x8x64xf32>
    %c2 = arith.constant 2 : index
    %c0_22 = arith.constant 0 : index
    %c0_23 = arith.constant 0 : index
    %22 = vector.load %arg3[%c2, %c0_22, %c0_23] : memref<11x8x1xf32, #tpu.memory_space<vmem>>, vector<1x8x1xf32>
    %23 = vector.shape_cast %22 : vector<1x8x1xf32> to vector<8x1xf32>
    %24 = vector.shape_cast %23 : vector<8x1xf32> to vector<1x8x1xf32>
    %c0_24 = arith.constant 0 : index
    %c0_25 = arith.constant 0 : index
    %c2_26 = arith.constant 2 : index
    %25 = vector.load %arg6[%c0_24, %c0_25, %c2_26] : memref<1x8x74xf32, #tpu.memory_space<vmem>>, vector<1x8x64xf32>
    %26 = vector.broadcast %24 : vector<1x8x1xf32> to vector<1x8x64xf32>
    %27 = arith.mulf %25, %26 : vector<1x8x64xf32>
    %28 = arith.addf %21, %27 : vector<1x8x64xf32>
    %c3 = arith.constant 3 : index
    %c0_27 = arith.constant 0 : index
    %c0_28 = arith.constant 0 : index
    %29 = vector.load %arg3[%c3, %c0_27, %c0_28] : memref<11x8x1xf32, #tpu.memory_space<vmem>>, vector<1x8x1xf32>
    %30 = vector.shape_cast %29 : vector<1x8x1xf32> to vector<8x1xf32>
    %31 = vector.shape_cast %30 : vector<8x1xf32> to vector<1x8x1xf32>
    %c0_29 = arith.constant 0 : index
    %c0_30 = arith.constant 0 : index
    %c3_31 = arith.constant 3 : index
    %32 = vector.load %arg6[%c0_29, %c0_30, %c3_31] : memref<1x8x74xf32, #tpu.memory_space<vmem>>, vector<1x8x64xf32>
    %33 = vector.broadcast %31 : vector<1x8x1xf32> to vector<1x8x64xf32>
    %34 = arith.mulf %32, %33 : vector<1x8x64xf32>
    %35 = arith.addf %28, %34 : vector<1x8x64xf32>
    %c4 = arith.constant 4 : index
    %c0_32 = arith.constant 0 : index
    %c0_33 = arith.constant 0 : index
    %36 = vector.load %arg3[%c4, %c0_32, %c0_33] : memref<11x8x1xf32, #tpu.memory_space<vmem>>, vector<1x8x1xf32>
    %37 = vector.shape_cast %36 : vector<1x8x1xf32> to vector<8x1xf32>
    %38 = vector.shape_cast %37 : vector<8x1xf32> to vector<1x8x1xf32>
    %c0_34 = arith.constant 0 : index
    %c0_35 = arith.constant 0 : index
    %c4_36 = arith.constant 4 : index
    %39 = vector.load %arg6[%c0_34, %c0_35, %c4_36] : memref<1x8x74xf32, #tpu.memory_space<vmem>>, vector<1x8x64xf32>
    %40 = vector.broadcast %38 : vector<1x8x1xf32> to vector<1x8x64xf32>
    %41 = arith.mulf %39, %40 : vector<1x8x64xf32>
    %42 = arith.addf %35, %41 : vector<1x8x64xf32>
    %c5_37 = arith.constant 5 : index
    %c0_38 = arith.constant 0 : index
    %c0_39 = arith.constant 0 : index
    %43 = vector.load %arg3[%c5_37, %c0_38, %c0_39] : memref<11x8x1xf32, #tpu.memory_space<vmem>>, vector<1x8x1xf32>
    %44 = vector.shape_cast %43 : vector<1x8x1xf32> to vector<8x1xf32>
    %45 = vector.shape_cast %44 : vector<8x1xf32> to vector<1x8x1xf32>
    %c0_40 = arith.constant 0 : index
    %c0_41 = arith.constant 0 : index
    %c5_42 = arith.constant 5 : index
    %46 = vector.load %arg6[%c0_40, %c0_41, %c5_42] : memref<1x8x74xf32, #tpu.memory_space<vmem>>, vector<1x8x64xf32>
    %47 = vector.broadcast %45 : vector<1x8x1xf32> to vector<1x8x64xf32>
    %48 = arith.mulf %46, %47 : vector<1x8x64xf32>
    %49 = arith.addf %42, %48 : vector<1x8x64xf32>
    %c6 = arith.constant 6 : index
    %c0_43 = arith.constant 0 : index
    %c0_44 = arith.constant 0 : index
    %50 = vector.load %arg3[%c6, %c0_43, %c0_44] : memref<11x8x1xf32, #tpu.memory_space<vmem>>, vector<1x8x1xf32>
    %51 = vector.shape_cast %50 : vector<1x8x1xf32> to vector<8x1xf32>
    %52 = vector.shape_cast %51 : vector<8x1xf32> to vector<1x8x1xf32>
    %c0_45 = arith.constant 0 : index
    %c0_46 = arith.constant 0 : index
    %c6_47 = arith.constant 6 : index
    %53 = vector.load %arg6[%c0_45, %c0_46, %c6_47] : memref<1x8x74xf32, #tpu.memory_space<vmem>>, vector<1x8x64xf32>
    %54 = vector.broadcast %52 : vector<1x8x1xf32> to vector<1x8x64xf32>
    %55 = arith.mulf %53, %54 : vector<1x8x64xf32>
    %56 = arith.addf %49, %55 : vector<1x8x64xf32>
    %c7 = arith.constant 7 : index
    %c0_48 = arith.constant 0 : index
    %c0_49 = arith.constant 0 : index
    %57 = vector.load %arg3[%c7, %c0_48, %c0_49] : memref<11x8x1xf32, #tpu.memory_space<vmem>>, vector<1x8x1xf32>
    %58 = vector.shape_cast %57 : vector<1x8x1xf32> to vector<8x1xf32>
    %59 = vector.shape_cast %58 : vector<8x1xf32> to vector<1x8x1xf32>
    %c0_50 = arith.constant 0 : index
    %c0_51 = arith.constant 0 : index
    %c7_52 = arith.constant 7 : index
    %60 = vector.load %arg6[%c0_50, %c0_51, %c7_52] : memref<1x8x74xf32, #tpu.memory_space<vmem>>, vector<1x8x64xf32>
    %61 = vector.broadcast %59 : vector<1x8x1xf32> to vector<1x8x64xf32>
    %62 = arith.mulf %60, %61 : vector<1x8x64xf32>
    %63 = arith.addf %56, %62 : vector<1x8x64xf32>
    %c8 = arith.constant 8 : index
    %c0_53 = arith.constant 0 : index
    %c0_54 = arith.constant 0 : index
    %64 = vector.load %arg3[%c8, %c0_53, %c0_54] : memref<11x8x1xf32, #tpu.memory_space<vmem>>, vector<1x8x1xf32>
    %65 = vector.shape_cast %64 : vector<1x8x1xf32> to vector<8x1xf32>
    %66 = vector.shape_cast %65 : vector<8x1xf32> to vector<1x8x1xf32>
    %c0_55 = arith.constant 0 : index
    %c0_56 = arith.constant 0 : index
    %c8_57 = arith.constant 8 : index
    %67 = vector.load %arg6[%c0_55, %c0_56, %c8_57] : memref<1x8x74xf32, #tpu.memory_space<vmem>>, vector<1x8x64xf32>
    %68 = vector.broadcast %66 : vector<1x8x1xf32> to vector<1x8x64xf32>
    %69 = arith.mulf %67, %68 : vector<1x8x64xf32>
    %70 = arith.addf %63, %69 : vector<1x8x64xf32>
    %c9 = arith.constant 9 : index
    %c0_58 = arith.constant 0 : index
    %c0_59 = arith.constant 0 : index
    %71 = vector.load %arg3[%c9, %c0_58, %c0_59] : memref<11x8x1xf32, #tpu.memory_space<vmem>>, vector<1x8x1xf32>
    %72 = vector.shape_cast %71 : vector<1x8x1xf32> to vector<8x1xf32>
    %73 = vector.shape_cast %72 : vector<8x1xf32> to vector<1x8x1xf32>
    %c0_60 = arith.constant 0 : index
    %c0_61 = arith.constant 0 : index
    %c9_62 = arith.constant 9 : index
    %74 = vector.load %arg6[%c0_60, %c0_61, %c9_62] : memref<1x8x74xf32, #tpu.memory_space<vmem>>, vector<1x8x64xf32>
    %75 = vector.broadcast %73 : vector<1x8x1xf32> to vector<1x8x64xf32>
    %76 = arith.mulf %74, %75 : vector<1x8x64xf32>
    %77 = arith.addf %70, %76 : vector<1x8x64xf32>
    %c10 = arith.constant 10 : index
    %c0_63 = arith.constant 0 : index
    %c0_64 = arith.constant 0 : index
    %78 = vector.load %arg3[%c10, %c0_63, %c0_64] : memref<11x8x1xf32, #tpu.memory_space<vmem>>, vector<1x8x1xf32>
    %79 = vector.shape_cast %78 : vector<1x8x1xf32> to vector<8x1xf32>
    %80 = vector.shape_cast %79 : vector<8x1xf32> to vector<1x8x1xf32>
    %c0_65 = arith.constant 0 : index
    %c0_66 = arith.constant 0 : index
    %c10_67 = arith.constant 10 : index
    %81 = vector.load %arg6[%c0_65, %c0_66, %c10_67] : memref<1x8x74xf32, #tpu.memory_space<vmem>>, vector<1x8x64xf32>
    %82 = vector.broadcast %80 : vector<1x8x1xf32> to vector<1x8x64xf32>
    %83 = arith.mulf %81, %82 : vector<1x8x64xf32>
    %84 = arith.addf %77, %83 : vector<1x8x64xf32>
    %cst_68 = arith.constant 5.000000e-01 : f32
    %85 = vector.broadcast %cst_68 : f32 to vector<1x8x64xf32>
    %86 = arith.mulf %85, %84 : vector<1x8x64xf32>
    %87 = math.tanh %86 : vector<1x8x64xf32>
    %cst_69 = arith.constant 5.000000e-01 : f32
    %88 = vector.broadcast %cst_69 : f32 to vector<1x8x64xf32>
    %89 = arith.mulf %88, %87 : vector<1x8x64xf32>
    %cst_70 = arith.constant 5.000000e-01 : f32
    %90 = vector.broadcast %cst_70 : f32 to vector<1x8x64xf32>
    %91 = arith.addf %89, %90 : vector<1x8x64xf32>
    %92 = arith.mulf %0, %91 : vector<1x8x64xf32>
    %c0_71 = arith.constant 0 : index
    %c0_72 = arith.constant 0 : index
    %c0_73 = arith.constant 0 : index
    %93 = vector.load %arg5[%c0_71, %c0_72, %c0_73] : memref<1x8x64xf32, #tpu.memory_space<vmem>>, vector<1x8x64xf32>
    tpu.vector_store %arg5[%c0_71, %c0_72, %c0_73], %92 {strides = array<i32>} : memref<1x8x64xf32, #tpu.memory_space<vmem>>, vector<1x8x64xf32>,
    return
  }
  func.func @transform_0(%arg0: i32, %arg1: i32) -> (i32, i32, i32) {
    %c0_i32 = arith.constant 0 : i32
    %c0_i32_0 = arith.constant 0 : i32
    return %arg0, %arg1, %c0_i32 : i32, i32, i32
  }
  func.func @transform_1(%arg0: i32, %arg1: i32) -> (i32, i32, i32) {
    %c0_i32 = arith.constant 0 : i32
    %c0_i32_0 = arith.constant 0 : i32
    %c0_i32_1 = arith.constant 0 : i32
    return %c0_i32, %arg1, %c0_i32_0 : i32, i32, i32
  }
  func.func @transform_2(%arg0: i32, %arg1: i32) -> (i32, i32) {
    %c0_i32 = arith.constant 0 : i32
    %c0_i32_0 = arith.constant 0 : i32
    return %arg1, %c0_i32 : i32, i32
  }
  func.func @transform_3(%arg0: i32, %arg1: i32) -> (i32, i32, i32) {
    %c0_i32 = arith.constant 0 : i32
    %c0_i32_0 = arith.constant 0 : i32
    return %arg0, %arg1, %c0_i32 : i32, i32, i32
  }
}

</mosaic_0001>

<bundles_post_ra>
// kernel: tpu_custom_call.1
= control target key start
LH: loop header
LB: loop body
LE: loop exit
PB: predicated region body
PF: predicated region fallthrough
CT: control target
= control target key end

     0   :  { %8 = vsyncpa [#allocation4], 0  ;;  %s865_s0 = inlined_call_operand.vmem [shape: f32[2,8,64], index: 0, kind: input, shape index: {}]   ;;  %s866_s1 = inlined_call_operand.vmem [shape: f32[11,8,1], index: 1, kind: input, shape index: {}]   ;;  %s867_s2 = inlined_call_operand.vmem [shape: f32[8,1], index: 2, kind: input, shape index: {}]   ;;  %s868_s3 = inlined_call_operand.hbm [shape: f32[2,8,64], index: 3, kind: output, shape index: {}]  }
   0x1   :  { %10 = vsyncpa [#allocation4 + $0x1], 0  ;;  %s713_s12 = smov 0   ;;  %s715_s13 = smov 0  }
   0x2   :  { %s717_s14 = smov 0   ;;  %s719_s15 = smov 0  }
   0x3   :  { %s721_s16 = smov 0   ;;  %s723_s17 = smov 0  }
   0x4 LB: > { %s504_s18 = sadd.s32 4294967295, %s677_s17   ;;  %s505_s19 = sadd.s32 4294967294, %s677_s17   ;;  %s677_s17 = sphi %s723_s17, %s16_s17   ;;  %s673_s16 = sphi %s721_s16, %s875_s16   ;;  %s669_s15 = sphi %s719_s15, %s874_s15   ;;  %s665_s14 = sphi %s717_s14, %s873_s14   ;;  %s661_s13 = sphi %s715_s13, %s872_s13   ;;  %s657_s12 = sphi %s713_s12, %s871_s12  }
   0x5   : > { %s28_s20 = sadd.s32 1, %s673_s16  ;;  %s117_s21 = sadd.s32 1, %s665_s14 }
   0x6   : > { %p30_p0 = scmp.ge.s32.totalorder %s28_s20, 2  ;;  %p127_p1 = scmp.ne.s32.totalorder %s665_s14, %s661_s13 }
   0x7   : > { %p128_p2 = scmp.eq.s32.totalorder %s504_s18, 1  ;;  %p133_p3 = scmp.ne.s32.totalorder %s661_s13, %s657_s12 }
   0x8   : > { %s877_s20 = smov (%p30_p0, %s28_s20), 0  ;;  %p134_p5 = scmp.eq.s32.totalorder %s505_s19, 1 }
   0x9   : > { %p753_p4 = por %p128_p2, %p127_p1  ;;  %s112_s23 = ssub.s32 %s673_s16, %s877_s20 }
   0xa   : > { %p510_p6 = scmp.ge.s32.totalorder %s677_s17, 1  ;;  %p115_p7 = scmp.eq.s32.totalorder %s112_s23, 0 }
   0xb   : > { %p760_p8 = por %p134_p5, %p133_p3  ;;  %p176_p9 = scmp.lt.s32.totalorder %s677_s17, 3 }
   0xc   : > { %s766_s25 = scalar_select %p115_p7, %s665_s14, %s117_s21  }
   0xd   : > { %p177_p10 = pnand %p510_p6, %p176_p9 }
   0xe   : > { %v514_v0 = vld [vmem:[%s866_s1 + $0x10] sm:$0xff] (!%p177_p10)  ;;  %p210_p11 = scmp.lt.s32.totalorder (!%p177_p10), %s669_s15, 1  ;;  %v679_v1 = vmov (!%p177_p10), 0   ;;  %vm226_vm0 = vcmask (!%p177_p10), 39936   ;;  %vm228_vm1 = vcmask (!%p177_p10), 605736   ;;  %v680_v2 = vmov (!%p177_p10), 0.0  }
   0xf   : > { %180 = sbr.rel (%p177_p10) target bundleno = 329 (0x149), region = 32  ;;  %596 = vset.pattern.permute.xlu1 (!%p177_p10), %v679_v1  ;;  %595 = vset.pattern.permute.xlu0 (!%p177_p10), %v679_v1  ;;  %227 = vst.msk [vmem:[#allocation2] sm:$0xff] (!%p177_p10), %vm226_vm0, %v680_v2  ;;  %v515_v3 = vld [vmem:[%s866_s1 + $0x18] sm:$0xff] (!%p177_p10)  ;;  %s681_s8 = smov (!%p177_p10), 5   ;;  %v516_v5 = vld [vmem:[%s866_s1 + $0x20] sm:$0xff] (!%p177_p10)  ;;  %v513_v6 = vld [vmem:[%s866_s1 + $0x8] sm:$0xff] (!%p177_p10) }
  0x10   : > { %268 = vperm.xlu1 (!%p177_p10), %596, %v514_v0   ;;  %229 = vst.msk [vmem:[#allocation2] sm:$0xff] (!%p177_p10), %vm228_vm1, %v680_v2  ;;  %v518_v7 = vld [vmem:[%s866_s1 + $0x30] sm:$0xff] (!%p177_p10)  ;;  %v517_v8 = vld [vmem:[%s866_s1 + $0x28] sm:$0xff] (!%p177_p10)  ;;  %v520_v9 = vld [vmem:[%s866_s1 + $0x40] sm:$0xff] (!%p177_p10)  ;;  %vm234_vm2 = vcmask (!%p177_p10), 564264   ;;  %s682_s18 = smov (!%p177_p10), 126  }
  0x11   : > { %v519_v10 = vld [vmem:[%s866_s1 + $0x38] sm:$0xff] (!%p177_p10)  ;;  %v522_v11 = vld [vmem:[%s866_s1 + $0x50] sm:$0xff] (!%p177_p10)  ;;  %v521_v12 = vld [vmem:[%s866_s1 + $0x48] sm:$0xff] (!%p177_p10)  ;;  %s683_s19 = smov (!%p177_p10), 124   ;;  %s684_s21 = smov (!%p177_p10), 127   ;;  %vm386_vm3 = vcmask (!%p177_p10), 523264  }
  0x12   : > { %v236_v13 = vld [vmem:[%s867_s2] sm:$0xff] (!%p177_p10)  ;;  %s685_s23 = smov (!%p177_p10), 122   ;;  %s686_s26 = smov (!%p177_p10), 125  }
  0x13   : > { %v237_v14 = vld [vmem:[%s866_s1] sm:$0xff] (!%p177_p10)  ;;  %s687_s27 = smov (!%p177_p10), 120   ;;  %s689_s29 = smov (!%p177_p10), 118  }
  0x14   : > { %281 = vperm.xlu1 (!%p177_p10), %596, %v515_v3   ;;  %s690_s30 = smov (!%p177_p10), 121   ;;  %s207_s5 = sand.u32 (!%p177_p10), 1, %s661_s13  }
  0x15   : > { %s511_s6 = sshll.u32 (!%p177_p10), %s207_s5, 3 }
  0x16   : > { %s211_s28 = scalar_select %p210_p11, %s669_s15, 1 }
  0x18   : > { %s512_s4 = sshll.u32 %s211_s28, 3  ;;  %294 = vperm.xlu1 %596, %v516_v5   ;;  %s688_s28 = smov 123  }
  0x19   : > { %s216_s7 = scalar_lea.vmem %s865_s0, %s512_s4  ;;  %s691_s4 = smov 119  }
  0x1a   : > { %v779_v4 = vld [vmem:[%s216_s7] sm:$0xff]  ;;  %s524_s7 = sshll.u32 %s669_s15, 7  ;;  %s692_s15 = smov [#allocation3]  }
  0x1b   : > { %231 = vrot.lane.b32.xlu0 %v779_v4, %s681_s8  ;;  %s209_s8 = scalar_lea.vmem [#allocation3], %s511_s6 }
  0x1c   : > { %320 = vperm.xlu1 %596, %v518_v7   ;;  %s403_s9 = sshll.u32 %s209_s8, 4  ;;  %s820_s9 = int_to_ptr.vmem [resolvable:$true] %s403_s9 }
  0x1f   : > { %255 = vperm.xlu0 %595, %v513_v6  }
  0x20   : > { %346 = vperm.xlu1 %596, %v520_v9  }
  0x23   : > { %307 = vperm.xlu0 %595, %v517_v8  }
  0x24   : > { %372 = vperm.xlu1 %596, %v522_v11  }
  0x27   : > { %333 = vperm.xlu0 %595, %v519_v10  }
  0x28   : > { %247 = vperm.xlu1 %596, %v236_v13  }
  0x2b   : > { %359 = vperm.xlu0 %595, %v521_v12  }
  0x2f   : > { %241 = vperm.xlu0 %595, %v237_v14  }
  0x8d   : > { %v232_v15 = vpop.permute.xlu0 %231 }
  0x8e   : > { %235 = vst.msk [vmem:[#allocation2] sm:$0xff] %vm234_vm2, %v232_v15 }
  0x8f   : > { %v269_v16 = vpop.permute.xlu1 %268 }
  0x93   : > { %v282_v19 = vpop.permute.xlu1 %281 }
  0x95   : > { %v238_v17 = vld [vmem:[#allocation2] sm:$0xff] }
  0x96   : > { %v271_v18 = vmul.f32 %v269_v16, %v238_v17  ;;  %v284_v27 = vmul.f32 %v282_v19, %v238_v17 }
  0x97   : > { %v295_v20 = vpop.permute.xlu1 %294 }
  0x98   : > { %273 = vrot.lane.b32.xlu1 %v271_v18, %s682_s18  ;;  %v297_v21 = vmul.f32 %v295_v20, %v238_v17  ;;  %s818_s18 = scalar_lea.hbm %s868_s3, %s524_s7 }
  0x9b   : > { %v321_v24 = vpop.permute.xlu1 %320 }
  0x9c   : > { %299 = vrot.lane.b32.xlu1 %v297_v21, %s683_s19  ;;  %v323_v25 = vmul.f32 %v321_v24, %v238_v17  ;;  %s389_s19 = scalar_lea.sflag [#allocation4], %s207_s5 }
  0x9e   : > { %v256_v22 = vpop.permute.xlu0 %255 }
  0x9f   : > { %v258_v23 = vmul.f32 %v256_v22, %v238_v17  ;;  %v347_v28 = vpop.permute.xlu1 %346 }
  0xa0   : > { %325 = vrot.lane.b32.xlu1 %v323_v25, %s685_s23  ;;  %v349_v29 = vmul.f32 %v347_v28, %v238_v17  ;;  %s603_s23 = sshll.u32 %s692_s15, 4  ;;  %s604_s23 = int_to_ptr.vmem [resolvable:$false] %s603_s23 }
  0xa1   : > { %260 = vrot.lane.b32.xlu0 %v258_v23, %s684_s21  ;;  %s599_s21 = scalar_lea.vmem %s820_s9, 128  ;;  %p606_p1 = scmp.lt.s32.totalorder %s820_s9, %s604_s23 }
  0xa2   : > { %v308_v26 = vpop.permute.xlu0 %307  ;;  %p600_p12 = scmp.ne.s32.totalorder %s820_s9, %s599_s21 }
  0xa3   : > { %v310_v31 = vmul.f32 %v308_v26, %v238_v17  ;;  %v373_v32 = vpop.permute.xlu1 %372 }
  0xa4   : > { %351 = vrot.lane.b32.xlu1 %v349_v29, %s687_s27  ;;  %v375_v33 = vmul.f32 %v373_v32, %v238_v17  ;;  %p601_p13 = pnand %p600_p12, %p753_p4 }
  0xa5   : > { %286 = vrot.lane.b32.xlu0 %v284_v27, %s686_s26  ;;  %s605_s26 = scalar_lea.vmem %s604_s23, 256 }
  0xa6   : > { %v334_v30 = vpop.permute.xlu0 %333  ;;  %p602_p0 = pneg %p601_p13  ;;  %p607_p2 = scmp.lt.s32.totalorder %s605_s26, %s599_s21 }
  0xa7   : > { %v336_v34 = vmul.f32 %v334_v30, %v238_v17  ;;  %v248_v37 = vpop.permute.xlu1 %247 }
  0xa8   : > { %377 = vrot.lane.b32.xlu1 %v375_v33, %s689_s29  ;;  %p608_p3 = por %p607_p2, %p606_p1 }
  0xa9   : > { %312 = vrot.lane.b32.xlu0 %v310_v31, %s688_s28 }
  0xaa   : > { %v360_v35 = vpop.permute.xlu0 %359  ;;  %p609_p5 = pnand %p608_p3, %p602_p0 }
  0xab   : > { %v362_v36 = vmul.f32 %v360_v35, %v238_v17 }
  0xad   : > { %338 = vrot.lane.b32.xlu0 %v336_v34, %s690_s30 }
  0xae   : > { %v242_v38 = vpop.permute.xlu0 %241 }
  0xaf   : > { %v244_v39 = vmul.f32 %v242_v38, %v238_v17 }
  0xb1   : > { %364 = vrot.lane.b32.xlu0 %v362_v36, %s691_s4  ;;  %v250_v41 = vadd.f32 %v248_v37, %v244_v39 }
 0x10a   : > { %v274_v40 = vpop.permute.xlu1 %273 }
 0x10e   : > { %v300_v42 = vpop.permute.xlu1 %299 }
 0x112   : > { %v326_v48 = vpop.permute.xlu1 %325 }
 0x113   : > { %v261_v43 = vpop.permute.xlu0 %260 }
 0x114   : > { %v263_v44 = vadd.f32 %v261_v43, %v250_v41 }
 0x116   : > { %v276_v45 = vadd.f32 %v274_v40, %v263_v44  ;;  %v352_v53 = vpop.permute.xlu1 %351 }
 0x117   : > { %v287_v46 = vpop.permute.xlu0 %286 }
 0x118   : > { %v289_v47 = vadd.f32 %v287_v46, %v276_v45 }
 0x11a   : > { %v302_v49 = vadd.f32 %v300_v42, %v289_v47  ;;  %v378_v59 = vpop.permute.xlu1 %377 }
 0x11b   : > { %v313_v50 = vpop.permute.xlu0 %312 }
 0x11c   : > { %v315_v51 = vadd.f32 %v313_v50, %v302_v49 }
 0x11e   : > { %v328_v52 = vadd.f32 %v326_v48, %v315_v51 }
 0x11f   : > { %v339_v54 = vpop.permute.xlu0 %338 }
 0x120   : > { %v341_v55 = vadd.f32 %v339_v54, %v328_v52 }
 0x122   : > { %v354_v56 = vadd.f32 %v352_v53, %v341_v55 }
 0x123   : > { %v365_v57 = vpop.permute.xlu0 %364 }
 0x124   : > { %v367_v58 = vadd.f32 %v365_v57, %v354_v56 }
 0x126   : > { %v380_v60 = vadd.f32 %v378_v59, %v367_v58 }
 0x128   : > { %v381_v61 = vmul.f32 0.5, %v380_v60 }
 0x12a   : > { %597 = vtanh.f32 %v381_v61 }
 0x134   : > { %v598_v62 = vpop.eup %597 }
 0x135   : > { %v383_v63 = vmul.f32 0.5, %v598_v62 }
 0x137   : > { %v384_v0 = vadd.f32 0.5, %v383_v63 }
 0x139   : > { %v385_v1 = vmul.f32 %v384_v0, %v779_v4 }
 0x13b   : > { %387 = vst.msk [vmem:[%s209_s8] sm:$0xff] %vm386_vm3, %v385_v1 }
 0x13c   : > { %612 = shalt.err (!%p609_p5)
}
 0x13d   : > { %s613_s27 = scalar_lea.hbm %s818_s18, 128  ;;  %s617_s30 = scalar_lea.hbm %s868_s3, 256 }
 0x13e   : > { %p614_p6 = scmp.ne.s32.totalorder %s818_s18, %s613_s27  ;;  %p618_p10 = scmp.lt.u32.totalorder %s818_s18, %s868_s3 }
 0x13f   : > { %p619_p11 = scmp.lt.u32.totalorder %s617_s30, %s613_s27  ;;  %p621_p13 = scmp.lt.u32.totalorder %s613_s27, %s818_s18 }
 0x140   : > { %p615_p7 = pnand %p614_p6, %p753_p4 }
 0x141   : > { %p620_p12 = por %p619_p11, %p618_p10 }
 0x142   : > { %p616_p9 = pneg %p615_p7 }
 0x143   : > { %p622_p0 = por %p621_p13, %p620_p12 }
 0x145   : > { %p623_p1 = pnand %p622_p0, %p616_p9 }
 0x147   : > { %626 = shalt.err (!%p623_p1)
}
 0x148   : > { %527 = dma.vmem_to_hbm [thread:$0]  (%p753_p4), %s820_s9, 128, %s818_s18, %s389_s19  }
 0x149 PF: > { %p533_p2 = scmp.ge.s32.totalorder %s677_s17, 2  ;;  %s415_s6 = sand.u32 1, %s657_s12  }
 0x14a   : > { %s416_s7 = scalar_lea.sflag [#allocation4], %s415_s6 }
 0x14b   : > { %p530_p3 = pnand %p533_p2, %p760_p8 }
 0x14d   : > { %652 = dma.done.wait (!%p530_p3), %s416_s7, 128  }
 0x14e   : > { %654 = vsyncadd (!%p530_p3), %s416_s7, 4294967168  ;;  %s16_s17 = sadd.s32 1, %s677_s17   ;;  %s871_s12 = smov %s661_s13 }
 0x14f   : > { %p13_p5 = scmp.ge.s32.totalorder %s16_s17, 4   ;;  %s872_s13 = smov %s665_s14 }
 0x150   : > { %s873_s14 = smov %s766_s25  ;;  %s874_s15 = smov %s673_s16 }
 0x151   : > { %s875_s16 = smov %s877_s20  ;;  %15 = sbr.rel (!%p13_p5) target bundleno = 4 (0x4), region = 83 }
 0x158   :  { %421 = vsyncpa [#allocation4], 1 }
 0x159   :  { %423 = vsyncpa [#allocation4 + $0x1], 1 }

</bundles_post_ra>
